<compile_context>
chip_gen: v6e
topology: v6e:2x2x1
jax: 0.10.0
libtpu: 0.0.40
codegen_flags: <defaults>
</compile_context>

<pallas_src>
import jax
import jax.numpy as jnp
from jax.experimental import pallas as pl
from jax.experimental.pallas import tpu as pltpu


# ---------------------------------------------------------------------------
# Kernel
# ---------------------------------------------------------------------------
def _down_kernel(x_ref, w_ref, o_ref):
    # x_ref: (1, TH2+1, 2, W2+1, 2*Cin) bf16
    #        one zero-padded row tile, rows folded as (row-pair p, parity s),
    #        cols folded as (col-pair, parity -> channel).
    # w_ref: (4, 2, 2*Cin, 4*Cout) bf16
    #        packed so the matmul output columns are already PixelUnshuffle(2)
    #        ordered: n = c*4 + i*2 + j.
    # o_ref: (1, TH2, W2, 4*Cout) f32
    TH2 = o_ref.shape[1]
    W2 = o_ref.shape[2]
    C4 = o_ref.shape[3]
    K2 = x_ref.shape[4]                      # 2*Cin

    acc = jnp.zeros((TH2 * W2, C4), jnp.float32)
    for ry in range(4):                      # input row offset relative to 2*h
        p, s = divmod(ry, 2)
        # rows 2*h + ry for h = 0..TH2-1  ==  row-pairs [p, p+TH2), parity s
        slab = x_ref[:, p:p + TH2, s:s + 1, :, :].reshape(TH2, W2 + 1, K2)
        for q in range(2):                   # input col-pair offset (rx = 2q + jq)
            lhs = slab[:, q:q + W2, :].reshape(TH2 * W2, K2)
            acc = acc + jnp.dot(lhs, w_ref[ry, q],
                                preferred_element_type=jnp.float32)
    o_ref[...] = acc.reshape(1, TH2, W2, C4).astype(o_ref.dtype)


# ---------------------------------------------------------------------------
# Weight packing (tiny, host/XLA side)
# ---------------------------------------------------------------------------
def _pack_weights(w_oihw, dtype):
    """Return slab (4, 2, 2*Cin, 4*Cout) with
       slab[ry, q, jq*Cin + ci, c*4 + i*2 + j] = w[c, ci, ry - i, (2q + jq) - j]
       (zero whenever ry - i or (2q+jq) - j falls outside [0, 2])."""
    Cout, Cin, _, _ = w_oihw.shape
    w_hwio = jnp.transpose(w_oihw, (2, 3, 1, 0))        # (3, 3, Cin, Cout)
    zeros = jnp.zeros((Cin, Cout), w_hwio.dtype)

    def tap(dy, dx):
        if 0 <= dy <= 2 and 0 <= dx <= 2:
            return w_hwio[dy, dx]
        return zeros

    ry_blocks = []
    for ry in range(4):
        q_blocks = []
        for q in range(2):
            rows = []
            for jq in range(2):
                rx = 2 * q + jq
                # (Cin, Cout, 2_i, 2_j) -> (Cin, 4*Cout) with col = c*4 + i*2 + j
                per_ij = jnp.stack(
                    [jnp.stack([tap(ry - i, rx - j) for j in range(2)], axis=-1)
                     for i in range(2)],
                    axis=-2)
                rows.append(per_ij.reshape(Cin, 4 * Cout))
            q_blocks.append(jnp.concatenate(rows, axis=0))   # (2*Cin, 4*Cout)
        ry_blocks.append(jnp.stack(q_blocks, axis=0))         # (2, 2*Cin, 4*Cout)
    return jnp.stack(ry_blocks, axis=0).astype(dtype)          # (4, 2, 2*Cin, 4*Cout)


# ---------------------------------------------------------------------------
# Wrapper
# ---------------------------------------------------------------------------
def _pick_tile_h(H, W, Cin, budget_bytes):
    # largest even divisor of H whose bf16 input tile fits the budget
    for th in range(H, 2, -2):
        if H % th:
            continue
        if (th + 2) * (W + 2) * Cin * 2 <= budget_bytes:
            return th
    return 2


def downsample_forward(x_nchw, w_oihw, *, tile_h=None, tile_budget_bytes=2 << 20):
    """Matches Downsample(n_feat).forward (conv 3x3 pad=1 no bias + PixelUnshuffle(2))."""
    B, Cin, H, W = x_nchw.shape
    Cout = w_oihw.shape[0]
    assert H % 2 == 0 and W % 2 == 0, "PixelUnshuffle(2) needs even H, W"

    TH = tile_h if tile_h is not None else _pick_tile_h(H, W, Cin, tile_budget_bytes)
    assert TH % 2 == 0 and H % TH == 0, (TH, H)
    nH = H // TH
    TH2, W2 = TH // 2, W // 2
    cdt = jnp.bfloat16

    # Single host-side prep pass: NCHW -> NHWC, bf16 cast, zero pad (padding=1),
    # overlapping row tiles (1-row halo) and (row/col)-pair folding.
    xh = jnp.transpose(x_nchw, (0, 2, 3, 1)).astype(cdt)          # (B, H, W, Cin)
    xp = jnp.pad(xh, ((0, 0), (1, 1), (1, 1), (0, 0)))            # (B, H+2, W+2, Cin)
    tiles = jnp.stack([xp[:, i * TH:i * TH + TH + 2] for i in range(nH)],
                      axis=1)                                     # (B, nH, TH+2, W+2, Cin)
    xf = tiles.reshape(B * nH, TH2 + 1, 2, W2 + 1, 2 * Cin)

    w_slab = _pack_weights(w_oihw, cdt)                           # (4, 2, 2Cin, 4Cout)

    out = pl.pallas_call(
        _down_kernel,
        out_shape=jax.ShapeDtypeStruct((B * nH, TH2, W2, 4 * Cout), jnp.float32),
        grid_spec=pltpu.PrefetchScalarGridSpec(
            num_scalar_prefetch=0,
            grid=(B * nH,),
            in_specs=[
                pl.BlockSpec((1, TH2 + 1, 2, W2 + 1, 2 * Cin),
                             lambda t: (t, 0, 0, 0, 0)),
                pl.BlockSpec((4, 2, 2 * Cin, 4 * Cout),
                             lambda t: (0, 0, 0, 0)),
            ],
            out_specs=pl.BlockSpec((1, TH2, W2, 4 * Cout),
                                   lambda t: (t, 0, 0, 0)),
        ),
        compiler_params=pltpu.CompilerParams(
            dimension_semantics=("parallel",)),
    )(xf, w_slab)

    # (B*nH, TH2, W2, 4Cout) -> (B, H/2, W/2, 4Cout) -> NCHW
    y = out.reshape(B, H // 2, W // 2, 4 * Cout)
    return jnp.transpose(y, (0, 3, 1, 2))


# ---------------------------------------------------------------------------
# Pure-JAX reference (for validation)
# ---------------------------------------------------------------------------
def _reference(x_nchw, w_oihw):
    y = jax.lax.conv_general_dilated(
        x_nchw, w_oihw, window_strides=(1, 1), padding=((1, 1), (1, 1)),
        dimension_numbers=("NCHW", "OIHW", "NCHW"),
        precision=jax.lax.Precision.HIGHEST)
    B, C, H, W = y.shape
    y = y.reshape(B, C, H // 2, 2, W // 2, 2)
    y = jnp.transpose(y, (0, 1, 3, 5, 2, 4))
    return y.reshape(B, C * 4, H // 2, W // 2)


if __name__ == "__main__":
    key = jax.random.PRNGKey(0)
    k_x, k_w = jax.random.split(key)

    B, n_feat, H, W = 2, 4, 16, 16
    x = jax.random.normal(k_x, (B, n_feat, H, W), dtype=jnp.float32)
    w = (jax.random.normal(k_w, (n_feat // 2, n_feat, 3, 3), dtype=jnp.float32)
         * (1.0 / (n_feat * 9) ** 0.5))

    # tile_h=8 -> two row tiles per batch element, exercising the halo/tiling path.
    out = downsample_forward(x, w, tile_h=8)
    out = jax.block_until_ready(out)

    # Reference on bf16-rounded inputs (the kernel feeds bf16 to the MXU with
    # f32 accumulation), exact up to accumulation order.
    xr = x.astype(jnp.bfloat16).astype(jnp.float32)
    wr = w.astype(jnp.bfloat16).astype(jnp.float32)
    ref = _reference(xr, wr)

    assert out.shape == (B, 2 * n_feat, H // 2, W // 2), out.shape
    err = float(jnp.max(jnp.abs(out - ref)))
    assert jnp.allclose(out, ref, atol=2e-3, rtol=2e-3), f"mismatch vs reference, max err {err}"

    print("KERNEL_OK")
</pallas_src>

<mosaic_0001>
module attributes {stable_mosaic.version = 11 : i64} {
  func.func @_down_kernel(%arg0: i32, %arg1: memref<1x5x2x9x8xbf16, #tpu.memory_space<vmem>>, %arg2: memref<4x2x8x8xbf16, #tpu.memory_space<vmem>>, %arg3: memref<1x4x8x8xf32, #tpu.memory_space<vmem>>) attributes {dimension_semantics = [#tpu.dimension_semantics<parallel>], iteration_bounds = array<i64: 4>, scalar_prefetch = 0 : i64, scratch_operands = 0 : i64, tpu.core_type = #tpu.core_type<tc>, window_params = [{transform_indices = @transform_0, window_bounds = array<i64: 1, 5, 2, 9, 8>}, {pipeline_mode = #tpu.pipeline_mode<synchronous>, transform_indices = @transform_1, window_bounds = array<i64: 4, 2, 8, 8>}, {transform_indices = @transform_2, window_bounds = array<i64: 1, 4, 8, 8>}]} {
    %cst = arith.constant 0.000000e+00 : f32
    %0 = vector.broadcast %cst : f32 to vector<32x8xf32>
    %c0 = arith.constant 0 : index
    %c0_0 = arith.constant 0 : index
    %c0_1 = arith.constant 0 : index
    %c0_2 = arith.constant 0 : index
    %c0_3 = arith.constant 0 : index
    %1 = vector.load %arg1[%c0, %c0_0, %c0_1, %c0_2, %c0_3] : memref<1x5x2x9x8xbf16, #tpu.memory_space<vmem>>, vector<1x4x1x9x8xbf16>
    %2 = vector.shape_cast %1 : vector<1x4x1x9x8xbf16> to vector<4x9x8xbf16>
    %3 = vector.extract_strided_slice %2 {offsets = [0, 0, 0], sizes = [4, 8, 8], strides = [1, 1, 1]} : vector<4x9x8xbf16> to vector<4x8x8xbf16>
    %4 = vector.shape_cast %3 : vector<4x8x8xbf16> to vector<32x8xbf16>
    %c0_4 = arith.constant 0 : index
    %c0_5 = arith.constant 0 : index
    %c0_6 = arith.constant 0 : index
    %c0_7 = arith.constant 0 : index
    %5 = vector.load %arg2[%c0_4, %c0_5, %c0_6, %c0_7] : memref<4x2x8x8xbf16, #tpu.memory_space<vmem>>, vector<1x1x8x8xbf16>
    %6 = vector.shape_cast %5 : vector<1x1x8x8xbf16> to vector<8x8xbf16>
    %cst_8 = arith.constant dense<0.000000e+00> : vector<32x8xf32>
    %7 = tpu.matmul %4, %6, %cst_8 {dimension_numbers = #tpu.dot_dimension_numbers<[1], [0], [0], [1], [0, 0, 1, 1], [], []>} : vector<32x8xbf16>, vector<8x8xbf16>, vector<32x8xf32> -> vector<32x8xf32>
    %8 = arith.addf %0, %7 : vector<32x8xf32>
    %9 = vector.extract_strided_slice %2 {offsets = [0, 1, 0], sizes = [4, 8, 8], strides = [1, 1, 1]} : vector<4x9x8xbf16> to vector<4x8x8xbf16>
    %10 = vector.shape_cast %9 : vector<4x8x8xbf16> to vector<32x8xbf16>
    %c0_9 = arith.constant 0 : index
    %c1 = arith.constant 1 : index
    %c0_10 = arith.constant 0 : index
    %c0_11 = arith.constant 0 : index
    %11 = vector.load %arg2[%c0_9, %c1, %c0_10, %c0_11] : memref<4x2x8x8xbf16, #tpu.memory_space<vmem>>, vector<1x1x8x8xbf16>
    %12 = vector.shape_cast %11 : vector<1x1x8x8xbf16> to vector<8x8xbf16>
    %cst_12 = arith.constant dense<0.000000e+00> : vector<32x8xf32>
    %13 = tpu.matmul %10, %12, %cst_12 {dimension_numbers = #tpu.dot_dimension_numbers<[1], [0], [0], [1], [0, 0, 1, 1], [], []>} : vector<32x8xbf16>, vector<8x8xbf16>, vector<32x8xf32> -> vector<32x8xf32>
    %14 = arith.addf %8, %13 : vector<32x8xf32>
    %c0_13 = arith.constant 0 : index
    %c0_14 = arith.constant 0 : index
    %c1_15 = arith.constant 1 : index
    %c0_16 = arith.constant 0 : index
    %c0_17 = arith.constant 0 : index
    %15 = vector.load %arg1[%c0_13, %c0_14, %c1_15, %c0_16, %c0_17] : memref<1x5x2x9x8xbf16, #tpu.memory_space<vmem>>, vector<1x4x1x9x8xbf16>
    %16 = vector.shape_cast %15 : vector<1x4x1x9x8xbf16> to vector<4x9x8xbf16>
    %17 = vector.extract_strided_slice %16 {offsets = [0, 0, 0], sizes = [4, 8, 8], strides = [1, 1, 1]} : vector<4x9x8xbf16> to vector<4x8x8xbf16>
    %18 = vector.shape_cast %17 : vector<4x8x8xbf16> to vector<32x8xbf16>
    %c1_18 = arith.constant 1 : index
    %c0_19 = arith.constant 0 : index
    %c0_20 = arith.constant 0 : index
    %c0_21 = arith.constant 0 : index
    %19 = vector.load %arg2[%c1_18, %c0_19, %c0_20, %c0_21] : memref<4x2x8x8xbf16, #tpu.memory_space<vmem>>, vector<1x1x8x8xbf16>
    %20 = vector.shape_cast %19 : vector<1x1x8x8xbf16> to vector<8x8xbf16>
    %cst_22 = arith.constant dense<0.000000e+00> : vector<32x8xf32>
    %21 = tpu.matmul %18, %20, %cst_22 {dimension_numbers = #tpu.dot_dimension_numbers<[1], [0], [0], [1], [0, 0, 1, 1], [], []>} : vector<32x8xbf16>, vector<8x8xbf16>, vector<32x8xf32> -> vector<32x8xf32>
    %22 = arith.addf %14, %21 : vector<32x8xf32>
    %23 = vector.extract_strided_slice %16 {offsets = [0, 1, 0], sizes = [4, 8, 8], strides = [1, 1, 1]} : vector<4x9x8xbf16> to vector<4x8x8xbf16>
    %24 = vector.shape_cast %23 : vector<4x8x8xbf16> to vector<32x8xbf16>
    %c1_23 = arith.constant 1 : index
    %c1_24 = arith.constant 1 : index
    %c0_25 = arith.constant 0 : index
    %c0_26 = arith.constant 0 : index
    %25 = vector.load %arg2[%c1_23, %c1_24, %c0_25, %c0_26] : memref<4x2x8x8xbf16, #tpu.memory_space<vmem>>, vector<1x1x8x8xbf16>
    %26 = vector.shape_cast %25 : vector<1x1x8x8xbf16> to vector<8x8xbf16>
    %cst_27 = arith.constant dense<0.000000e+00> : vector<32x8xf32>
    %27 = tpu.matmul %24, %26, %cst_27 {dimension_numbers = #tpu.dot_dimension_numbers<[1], [0], [0], [1], [0, 0, 1, 1], [], []>} : vector<32x8xbf16>, vector<8x8xbf16>, vector<32x8xf32> -> vector<32x8xf32>
    %28 = arith.addf %22, %27 : vector<32x8xf32>
    %c0_28 = arith.constant 0 : index
    %c1_29 = arith.constant 1 : index
    %c0_30 = arith.constant 0 : index
    %c0_31 = arith.constant 0 : index
    %c0_32 = arith.constant 0 : index
    %29 = vector.load %arg1[%c0_28, %c1_29, %c0_30, %c0_31, %c0_32] : memref<1x5x2x9x8xbf16, #tpu.memory_space<vmem>>, vector<1x4x1x9x8xbf16>
    %30 = vector.shape_cast %29 : vector<1x4x1x9x8xbf16> to vector<4x9x8xbf16>
    %31 = vector.extract_strided_slice %30 {offsets = [0, 0, 0], sizes = [4, 8, 8], strides = [1, 1, 1]} : vector<4x9x8xbf16> to vector<4x8x8xbf16>
    %32 = vector.shape_cast %31 : vector<4x8x8xbf16> to vector<32x8xbf16>
    %c2 = arith.constant 2 : index
    %c0_33 = arith.constant 0 : index
    %c0_34 = arith.constant 0 : index
    %c0_35 = arith.constant 0 : index
    %33 = vector.load %arg2[%c2, %c0_33, %c0_34, %c0_35] : memref<4x2x8x8xbf16, #tpu.memory_space<vmem>>, vector<1x1x8x8xbf16>
    %34 = vector.shape_cast %33 : vector<1x1x8x8xbf16> to vector<8x8xbf16>
    %cst_36 = arith.constant dense<0.000000e+00> : vector<32x8xf32>
    %35 = tpu.matmul %32, %34, %cst_36 {dimension_numbers = #tpu.dot_dimension_numbers<[1], [0], [0], [1], [0, 0, 1, 1], [], []>} : vector<32x8xbf16>, vector<8x8xbf16>, vector<32x8xf32> -> vector<32x8xf32>
    %36 = arith.addf %28, %35 : vector<32x8xf32>
    %37 = vector.extract_strided_slice %30 {offsets = [0, 1, 0], sizes = [4, 8, 8], strides = [1, 1, 1]} : vector<4x9x8xbf16> to vector<4x8x8xbf16>
    %38 = vector.shape_cast %37 : vector<4x8x8xbf16> to vector<32x8xbf16>
    %c2_37 = arith.constant 2 : index
    %c1_38 = arith.constant 1 : index
    %c0_39 = arith.constant 0 : index
    %c0_40 = arith.constant 0 : index
    %39 = vector.load %arg2[%c2_37, %c1_38, %c0_39, %c0_40] : memref<4x2x8x8xbf16, #tpu.memory_space<vmem>>, vector<1x1x8x8xbf16>
    %40 = vector.shape_cast %39 : vector<1x1x8x8xbf16> to vector<8x8xbf16>
    %cst_41 = arith.constant dense<0.000000e+00> : vector<32x8xf32>
    %41 = tpu.matmul %38, %40, %cst_41 {dimension_numbers = #tpu.dot_dimension_numbers<[1], [0], [0], [1], [0, 0, 1, 1], [], []>} : vector<32x8xbf16>, vector<8x8xbf16>, vector<32x8xf32> -> vector<32x8xf32>
    %42 = arith.addf %36, %41 : vector<32x8xf32>
    %c0_42 = arith.constant 0 : index
    %c1_43 = arith.constant 1 : index
    %c1_44 = arith.constant 1 : index
    %c0_45 = arith.constant 0 : index
    %c0_46 = arith.constant 0 : index
    %43 = vector.load %arg1[%c0_42, %c1_43, %c1_44, %c0_45, %c0_46] : memref<1x5x2x9x8xbf16, #tpu.memory_space<vmem>>, vector<1x4x1x9x8xbf16>
    %44 = vector.shape_cast %43 : vector<1x4x1x9x8xbf16> to vector<4x9x8xbf16>
    %45 = vector.extract_strided_slice %44 {offsets = [0, 0, 0], sizes = [4, 8, 8], strides = [1, 1, 1]} : vector<4x9x8xbf16> to vector<4x8x8xbf16>
    %46 = vector.shape_cast %45 : vector<4x8x8xbf16> to vector<32x8xbf16>
    %c3 = arith.constant 3 : index
    %c0_47 = arith.constant 0 : index
    %c0_48 = arith.constant 0 : index
    %c0_49 = arith.constant 0 : index
    %47 = vector.load %arg2[%c3, %c0_47, %c0_48, %c0_49] : memref<4x2x8x8xbf16, #tpu.memory_space<vmem>>, vector<1x1x8x8xbf16>
    %48 = vector.shape_cast %47 : vector<1x1x8x8xbf16> to vector<8x8xbf16>
    %cst_50 = arith.constant dense<0.000000e+00> : vector<32x8xf32>
    %49 = tpu.matmul %46, %48, %cst_50 {dimension_numbers = #tpu.dot_dimension_numbers<[1], [0], [0], [1], [0, 0, 1, 1], [], []>} : vector<32x8xbf16>, vector<8x8xbf16>, vector<32x8xf32> -> vector<32x8xf32>
    %50 = arith.addf %42, %49 : vector<32x8xf32>
    %51 = vector.extract_strided_slice %44 {offsets = [0, 1, 0], sizes = [4, 8, 8], strides = [1, 1, 1]} : vector<4x9x8xbf16> to vector<4x8x8xbf16>
    %52 = vector.shape_cast %51 : vector<4x8x8xbf16> to vector<32x8xbf16>
    %c3_51 = arith.constant 3 : index
    %c1_52 = arith.constant 1 : index
    %c0_53 = arith.constant 0 : index
    %c0_54 = arith.constant 0 : index
    %53 = vector.load %arg2[%c3_51, %c1_52, %c0_53, %c0_54] : memref<4x2x8x8xbf16, #tpu.memory_space<vmem>>, vector<1x1x8x8xbf16>
    %54 = vector.shape_cast %53 : vector<1x1x8x8xbf16> to vector<8x8xbf16>
    %cst_55 = arith.constant dense<0.000000e+00> : vector<32x8xf32>
    %55 = tpu.matmul %52, %54, %cst_55 {dimension_numbers = #tpu.dot_dimension_numbers<[1], [0], [0], [1], [0, 0, 1, 1], [], []>} : vector<32x8xbf16>, vector<8x8xbf16>, vector<32x8xf32> -> vector<32x8xf32>
    %56 = arith.addf %50, %55 : vector<32x8xf32>
    %57 = vector.shape_cast %56 : vector<32x8xf32> to vector<1x4x8x8xf32>
    %c0_56 = arith.constant 0 : index
    %c0_57 = arith.constant 0 : index
    %c0_58 = arith.constant 0 : index
    %c0_59 = arith.constant 0 : index
    %58 = vector.load %arg3[%c0_56, %c0_57, %c0_58, %c0_59] : memref<1x4x8x8xf32, #tpu.memory_space<vmem>>, vector<1x4x8x8xf32>
    tpu.vector_store %arg3[%c0_56, %c0_57, %c0_58, %c0_59], %57 {strides = array<i32>} : memref<1x4x8x8xf32, #tpu.memory_space<vmem>>, vector<1x4x8x8xf32>,
    return
  }
  func.func @transform_0(%arg0: i32) -> (i32, i32, i32, i32, i32) {
    %c0_i32 = arith.constant 0 : i32
    %c0_i32_0 = arith.constant 0 : i32
    %c0_i32_1 = arith.constant 0 : i32
    %c0_i32_2 = arith.constant 0 : i32
    %c0_i32_3 = arith.constant 0 : i32
    return %arg0, %c0_i32, %c0_i32_0, %c0_i32_1, %c0_i32_2 : i32, i32, i32, i32, i32
  }
  func.func @transform_1(%arg0: i32) -> (i32, i32, i32, i32) {
    %c0_i32 = arith.constant 0 : i32
    %c0_i32_0 = arith.constant 0 : i32
    %c0_i32_1 = arith.constant 0 : i32
    %c0_i32_2 = arith.constant 0 : i32
    %c0_i32_3 = arith.constant 0 : i32
    return %c0_i32, %c0_i32_0, %c0_i32_1, %c0_i32_2 : i32, i32, i32, i32
  }
  func.func @transform_2(%arg0: i32) -> (i32, i32, i32, i32) {
    %c0_i32 = arith.constant 0 : i32
    %c0_i32_0 = arith.constant 0 : i32
    %c0_i32_1 = arith.constant 0 : i32
    %c0_i32_2 = arith.constant 0 : i32
    return %arg0, %c0_i32, %c0_i32_0, %c0_i32_1 : i32, i32, i32, i32
  }
}

</mosaic_0001>

<bundles_post_ra>
// kernel: tpu_custom_call.1
= control target key start
LH: loop header
LB: loop body
LE: loop exit
PB: predicated region body
PF: predicated region fallthrough
CT: control target
= control target key end

     0   :  { %7 = vsyncpa [#allocation3], 0  ;;  %s1629_s0 = inlined_call_operand.vmem [shape: bf16[4,5,2,9,8], index: 0, kind: input, shape index: {}]   ;;  %s1630_s1 = inlined_call_operand.vmem [shape: bf16[4,2,8,8], index: 1, kind: input, shape index: {}]   ;;  %s1631_s2 = inlined_call_operand.hbm [shape: f32[4,4,8,8], index: 2, kind: output, shape index: {}]  }
   0x1   :  { %9 = vsyncpa [#allocation3 + $0x1], 0  ;;  %s1339_s9 = smov 0   ;;  %s1341_s10 = smov 0  }
   0x2   :  { %s1343_s11 = smov 0   ;;  %s1345_s12 = smov 0  }
   0x3 LB: > { %s1360_s13 = sadd.s32 4294967295, %s1319_s12   ;;  %s1054_s14 = sadd.s32 4294967294, %s1319_s12   ;;  %s1319_s12 = sphi %s1345_s12, %s1639_s12   ;;  %s1315_s11 = sphi %s1343_s11, %s1638_s11   ;;  %s1311_s10 = sphi %s1341_s10, %s1637_s10   ;;  %s1307_s9 = sphi %s1339_s9, %s1636_s9  }
   0x4   : > { %s1364_s15 = sadd.s32 1, %s1319_s12   ;;  %s69_s16 = sadd.s32 1, %s1315_s11 }
   0x5   : > { %s66_s17 = ssub.s32 %s1319_s12, %s1364_s15  ;;  %p79_p0 = scmp.ne.s32.totalorder %s1315_s11, %s1311_s10 }
   0x6   : > { %p67_p1 = scmp.eq.s32.totalorder %s66_s17, 0  ;;  %p80_p2 = scmp.eq.s32.totalorder %s1360_s13, 3 }
   0x7   : > { %p85_p3 = scmp.ne.s32.totalorder %s1311_s10, %s1307_s9  ;;  %p86_p4 = scmp.eq.s32.totalorder %s1054_s14, 3 }
   0x8   : > { %s1375_s18 = scalar_select %p67_p1, %s1315_s11, %s69_s16  }
   0x9   : > { %p1377_p5 = por %p80_p2, %p79_p0  ;;  %p1381_p6 = por %p86_p4, %p85_p3 }
   0xa   : > { %p1057_p7 = scmp.ge.s32.totalorder %s1319_s12, 1  ;;  %p115_p8 = scmp.lt.s32.totalorder %s1319_s12, 5 }
   0xc   : > { %p116_p9 = pnand %p1057_p7, %p115_p8 }
   0xd   : > { %p137_p10 = scmp.lt.s32.totalorder (!%p116_p9), %s1360_s13, 3  ;;  %s134_s23 = sand.u32 (!%p116_p9), 1, %s1311_s10  }
   0xe   : > { %119 = sbr.rel (%p116_p9) target bundleno = 286 (0x11e), region = 28  ;;  %s1058_s24 = sshll.u32 (!%p116_p9), %s134_s23, 5 }
   0xf   : > { %s1128_s27 = sshll.u32 (!%p116_p9), %s1360_s13, 9 }
  0x10   : > { %s1581_s30 = scalar_lea.hbm (!%p116_p9), %s1631_s2, %s1128_s27 }
  0x13   : > { %v151_v0 = vld [vmem:[%s1630_s1] sm:$0xf]  ;;  %vm226_vm0 = vcmask 1043456   ;;  %v1060_v1 = vld [vmem:[%s1630_s1 + $0x4] sm:$0xf]  ;;  %s138_s25 = scalar_select %p137_p10, %s1360_s13, 3 }
  0x14   : > { %1202 = vmatprep.subr.msk.bf16.mxu1 %vm226_vm0, %v151_v0  ;;  %v296_v2 = vsel %vm226_vm0, %v151_v0, 0  ;;  %1201 = vmatprep.subr.msk.bf16.mxu0 %vm226_vm0, %v1060_v1  ;;  %v228_v3 = vsel %vm226_vm0, %v1060_v1, 0  ;;  %v1077_v4 = vld [vmem:[%s1630_s1 + $0x8] sm:$0xf]  ;;  %vm152_vm1 = vsmask.f32 3328 }
  0x15   : > { %1160 = vmatpush3.bf16.msra.mxu1 %v296_v2  ;;  %1154 = vmatpush3.bf16.msra.mxu0 %v228_v3  ;;  %v1082_v5 = vld [vmem:[%s1630_s1 + $0xc] sm:$0xf]  ;;  %v1409_v6 = vld [vmem:[%s1630_s1 + $0x10] sm:$0xf]  ;;  %s1209_s4 = smul.u32 80, %s138_s25  ;;  %vm219_vm2 = vcmask 64512  }
  0x16   : > { %1203 = vmatprep.subr.msk.bf16.mxu0 %vm226_vm0, %v1077_v4  ;;  %vm153_vm3 = vsmask.f32 7440  ;;  %1204 = vmatprep.subr.msk.bf16.mxu1 %vm226_vm0, %v1082_v5  ;;  %v1100_v7 = vld [vmem:[%s1630_s1 + $0x14] sm:$0xf]  ;;  %v1416_v8 = vsel %vm226_vm0, %v1077_v4, 0  ;;  %v501_v9 = vsel %vm226_vm0, %v1082_v5, 0 }
  0x17   : > { %v1422_v10 = vld [vmem:[%s1630_s1 + $0x18] sm:$0xf]  ;;  %v1427_v11 = vld [vmem:[%s1630_s1 + $0x1c] sm:$0xf]  ;;  %s1432_s22 = scalar_lea.vmem %s1629_s0, %s1209_s4  ;;  %v1436_v12 = vsel %vm226_vm0, %v1409_v6, 0  ;;  %v1439_v13 = vsel %vm226_vm0, %v1100_v7, 0  ;;  %vm1460_vm4 = vmor %vm152_vm1, %vm153_vm3 }
  0x18   : > { %v1443_v14 = vsel %vm226_vm0, %v1422_v10, 0  ;;  %v1447_v15 = vsel %vm226_vm0, %v1427_v11, 0  ;;  %v143_v16 = vld [vmem:[%s1432_s22] sm:$0xf]  ;;  %v145_v17 = vld [vmem:[%s1432_s22 + $0x10] sm:$0xf] }
  0x19   : > { %v147_v18 = vld [vmem:[%s1432_s22 + $0x20] sm:$0xf]  ;;  %v156_v19 = vshrl.u32 %v143_v16, 16  ;;  %v159_v20 = vshll.u32 %v143_v16, 16  ;;  %v170_v21 = vshrl.u32 %v145_v17, 16  ;;  %v173_v22 = vshll.u32 %v145_v17, 16 }
  0x1a   : > { %v149_v23 = vld [vmem:[%s1432_s22 + $0x30] sm:$0xf]  ;;  %v1065_v24 = vcombine.low %v143_v16, %v145_v17  ;;  %v184_v25 = vshrl.u32 %v147_v18, 16  ;;  %v187_v26 = vshll.u32 %v147_v18, 16  ;;  %v144_v28 = vld [vmem:[%s1432_s22 + $0x4] sm:$0x1] }
  0x1b   : > { %v198_v27 = vshrl.u32 %v149_v23, 16  ;;  %v158_v29 = vrot.slane %v156_v19, 4  ;;  %v161_v30 = vrot.slane %v159_v20, 5  ;;  %v172_v31 = vrot.slane %v170_v21, 4  ;;  %v146_v33 = vld [vmem:[%s1432_s22 + $0x14] sm:$0x1] }
  0x1c   : > { %v175_v32 = vrot.slane %v173_v22, 5  ;;  %1161 = vmatprep.mubr.msk.bf16.mxu1 %vm219_vm2, %v1065_v24  ;;  %v186_v34 = vrot.slane %v184_v25, 4  ;;  %v189_v35 = vrot.slane %v187_v26, 5  ;;  %v201_v37 = vshll.u32 %v149_v23, 16  ;;  %v148_v38 = vld [vmem:[%s1432_s22 + $0x24] sm:$0x1] }
  0x1d   : > { %v200_v36 = vrot.slane %v198_v27, 4  ;;  %v1066_v39 = vcombine.low %v147_v18, %v149_v23  ;;  %v162_v40 = vor.u32 %v161_v30, %v158_v29  ;;  %v165_v41 = vshll.u32 %v144_v28, 16  ;;  %v150_v43 = vld [vmem:[%s1432_s22 + $0x34] sm:$0x1]  ;;  %v1465_v49 = vld [vmem:[%s1432_s22 + $0x8] sm:$0xf] }
  0x1e   : > { %v176_v42 = vor.u32 %v175_v32, %v172_v31  ;;  %v203_v44 = vrot.slane %v201_v37, 5  ;;  %v179_v46 = vshll.u32 %v146_v33, 16  ;;  %v190_v47 = vor.u32 %v189_v35, %v186_v34  ;;  %v1070_v54 = vld [vmem:[%s1432_s22 + $0xc] sm:$0x1]  ;;  %v1071_v59 = vld [vmem:[%s1432_s22 + $0x18] sm:$0xf] }
  0x1f   : > { %v193_v48 = vshll.u32 %v148_v38, 16  ;;  %1162 = vmatmul.mubr.msk.bf16.vlgmr.msra.gmra.mxu1 %vm219_vm2, %v1066_v39  ;;  %v163_v50 = vrot.slane %v162_v40, 4  ;;  %v167_v51 = vrot.slane %v165_v41, 5  ;;  %v207_v53 = vshll.u32 %v150_v43, 16  ;;  %v1072_v62 = vld [vmem:[%s1432_s22 + $0x1c] sm:$0x1] }
  0x20   : > { %v177_v52 = vrot.slane %v176_v42, 4  ;;  %v181_v55 = vrot.slane %v179_v46, 5  ;;  %v191_v56 = vrot.slane %v190_v47, 4  ;;  %v204_v58 = vor.u32 %v203_v44, %v200_v36  ;;  %1172 = vmatpush3.bf16.msra.mxu1 %v501_v9  ;;  %v1481_v5 = vld [vmem:[%s1432_s22 + $0x28] sm:$0xf]  ;;  %s136_s25 = scalar_lea.vmem [#allocation2], %s1058_s24 }
  0x21   : > { %v195_v57 = vrot.slane %v193_v48, 5  ;;  %v168_v60 = vsel %vm1460_vm4, %v163_v50, %v167_v51  ;;  %v209_v61 = vrot.slane %v207_v53, 5  ;;  %v431_v63 = vshrl.u32 %v1465_v49, 16  ;;  %1206 = vmatprep.subr.msk.bf16.mxu1 %vm226_vm0, %v1100_v7  ;;  %v1074_v19 = vld [vmem:[%s1432_s22 + $0x2c] sm:$0x1]  ;;  %s992_s26 = sshll.u32 %s136_s25, 4  ;;  %s1583_s26 = int_to_ptr.vmem [resolvable:$true] %s992_s26 }
  0x22   : > { %v434_v0 = vshll.u32 %v1465_v49, 16  ;;  %v182_v1 = vsel %vm1460_vm4, %v177_v52, %v181_v55  ;;  %v205_v3 = vrot.slane %v204_v58, 4  ;;  %v440_v4 = vshll.u32 %v1070_v54, 16  ;;  %v1075_v23 = vld [vmem:[%s1432_s22 + $0x38] sm:$0xf]  ;;  %s1589_s13 = scalar_lea.sflag [#allocation3], %s134_s23 }
  0x23   : > { %v196_v2 = vsel %vm1460_vm4, %v191_v56, %v195_v57  ;;  %v1061_v9 = vcombine.low %v168_v60, %v182_v1  ;;  %v433_v16 = vrot.slane %v431_v63, 4  ;;  %v445_v18 = vshrl.u32 %v1071_v59, 16  ;;  %v1076_v27 = vld [vmem:[%s1432_s22 + $0x3c] sm:$0x1]  ;;  %v1493_v37 = vld [vmem:[%s1432_s22 + $0x10] sm:$0xf] }
  0x24   : > { %v436_v17 = vrot.slane %v434_v0, 5  ;;  %v210_v20 = vsel %vm1460_vm4, %v205_v3, %v209_v61  ;;  %v442_v7 = vrot.slane %v440_v4, 5  ;;  %v448_v21 = vshll.u32 %v1071_v59, 16  ;;  %v1088_v42 = vld [vmem:[%s1432_s22 + $0x14] sm:$0x1]  ;;  %s1259_s3 = scalar_lea.vmem %s1583_s26, 512 }
  0x25   : > { %v454_v22 = vshll.u32 %v1072_v62, 16  ;;  %1155 = vmatprep.mubr.msk.bf16.mxu0 %vm219_vm2, %v1061_v9  ;;  %v1062_v24 = vcombine.low %v196_v2, %v210_v20  ;;  %v447_v26 = vrot.slane %v445_v18, 4  ;;  %v459_v28 = vshrl.u32 %v1481_v5, 16  ;;  %v1503_v48 = vld [vmem:[%s1432_s22 + $0x20] sm:$0xf]  ;;  %p1260_p11 = scmp.ne.s32.totalorder %s1583_s26, %s1259_s3  ;;  %s1321_s4 = smov [#allocation2]  }
  0x26   : > { %v437_v25 = vor.u32 %v436_v17, %v433_v16  ;;  %v450_v29 = vrot.slane %v448_v21, 5  ;;  %v462_v31 = vshll.u32 %v1481_v5, 16  ;;  %v468_v32 = vshll.u32 %v1074_v19, 16  ;;  %v1090_v54 = vld [vmem:[%s1432_s22 + $0x24] sm:$0x1]  ;;  %s1263_s5 = sshll.u32 %s1321_s4, 4  ;;  %s1264_s5 = int_to_ptr.vmem [resolvable:$false] %s1263_s5 }
  0x27   : > { %v456_v30 = vrot.slane %v454_v22, 5  ;;  %1156 = vmatmul.mubr.msk.bf16.vlgmr.msra.gmra.mxu0 %vm219_vm2, %v1062_v24  ;;  %v461_v34 = vrot.slane %v459_v28, 4  ;;  %v473_v35 = vshrl.u32 %v1075_v23, 16  ;;  %v476_v36 = vshll.u32 %v1075_v23, 16  ;;  %v1091_v60 = vld [vmem:[%s1432_s22 + $0x30] sm:$0xf]  ;;  %p1261_p12 = pnand %p1260_p11, %p1377_p5  ;;  %p1266_p0 = scmp.lt.s32.totalorder %s1583_s26, %s1264_s5 }
  0x28   : > { %v438_v33 = vrot.slane %v437_v25, 4  ;;  %1166 = vmatpush3.bf16.msra.mxu0 %v1416_v8  ;;  %v451_v38 = vor.u32 %v450_v29, %v447_v26  ;;  %v464_v39 = vrot.slane %v462_v31, 5  ;;  %v470_v40 = vrot.slane %v468_v32, 5  ;;  %v1092_v1 = vld [vmem:[%s1432_s22 + $0x34] sm:$0x1]  ;;  %s1265_s6 = scalar_lea.vmem %s1264_s5, 1024 }
  0x29   : > { %v482_v41 = vshll.u32 %v1076_v27, 16  ;;  %v475_v44 = vrot.slane %v473_v35, 4  ;;  %v478_v46 = vrot.slane %v476_v36, 5  ;;  %v1078_v47 = vcombine.low %v1465_v49, %v1071_v59  ;;  %1205 = vmatprep.subr.msk.bf16.mxu0 %vm226_vm0, %v1409_v6  ;;  %v1093_v9 = vld [vmem:[%s1432_s22 + $0x40] sm:$0xf]  ;;  %p1262_p13 = pneg %p1261_p12  ;;  %p1267_p1 = scmp.lt.s32.totalorder %s1265_s6, %s1259_s3 }
  0x2a   : > { %v443_v43 = vsel %vm1460_vm4, %v438_v33, %v442_v7  ;;  %v452_v8 = vrot.slane %v451_v38, 4  ;;  %v465_v50 = vor.u32 %v464_v39, %v461_v34  ;;  %v1079_v52 = vcombine.low %v1481_v5, %v1075_v23  ;;  %v1094_v21 = vld [vmem:[%s1432_s22 + $0x44] sm:$0x1]  ;;  %v1529_v31 = vld [vmem:[%s1432_s22 + $0x18] sm:$0xf] }
  0x2b   : > { %v484_v51 = vrot.slane %v482_v41, 5  ;;  %v479_v53 = vor.u32 %v478_v46, %v475_v44  ;;  %1167 = vmatprep.mubr.msk.bf16.mxu0 %vm219_vm2, %v1078_v47  ;;  %v640_v55 = vshrl.u32 %v1493_v37, 16  ;;  %v643_v49 = vshll.u32 %v1493_v37, 16  ;;  %v1106_v35 = vld [vmem:[%s1432_s22 + $0x1c] sm:$0x1]  ;;  %p1268_p2 = por %p1267_p1, %p1266_p0 }
  0x2c   : > { %v649_v56 = vshll.u32 %v1088_v42, 16  ;;  %v457_v6 = vsel %vm1460_vm4, %v452_v8, %v456_v30  ;;  %v466_v57 = vrot.slane %v465_v50, 4  ;;  %v654_v58 = vshrl.u32 %v1503_v48, 16  ;;  %v1107_v36 = vld [vmem:[%s1432_s22 + $0x28] sm:$0xf] }
  0x2d   : > { %v657_v59 = vshll.u32 %v1503_v48, 16  ;;  %v1083_v61 = vcombine.low %v443_v43, %v457_v6  ;;  %v480_v62 = vrot.slane %v479_v53, 4  ;;  %v642_v63 = vrot.slane %v640_v55, 4  ;;  %v1109_v46 = vld [vmem:[%s1432_s22 + $0x38] sm:$0xf]  ;;  %p1269_p3 = pnand %p1268_p2, %p1262_p13 }
  0x2e   : > { %v645_v0 = vrot.slane %v643_v49, 5  ;;  %v471_v2 = vsel %vm1460_vm4, %v466_v57, %v470_v40  ;;  %v651_v3 = vrot.slane %v649_v56, 5  ;;  %v656_v4 = vrot.slane %v654_v58, 4  ;;  %v1111_v55 = vld [vmem:[%s1432_s22 + $0x48] sm:$0xf] }
  0x2f   : > { %v659_v5 = vrot.slane %v657_v59, 5  ;;  %1173 = vmatprep.mubr.msk.bf16.mxu1 %vm219_vm2, %v1083_v61  ;;  %v485_v16 = vsel %vm1460_vm4, %v480_v62, %v484_v51  ;;  %1168 = vmatmul.mubr.msk.bf16.vlgmr.msra.gmra.mxu0 %vm219_vm2, %v1079_v52  ;;  %v663_v18 = vshll.u32 %v1090_v54, 16  ;;  %v668_v19 = vshrl.u32 %v1091_v60, 16  ;;  %v1110_v51 = vld [vmem:[%s1432_s22 + $0x3c] sm:$0x1] }
  0x30   : > { %v646_v17 = vor.u32 %v645_v0, %v642_v63  ;;  %v1084_v20 = vcombine.low %v471_v2, %v485_v16  ;;  %1178 = vmatpush3.bf16.msra.mxu0 %v1436_v12  ;;  %v671_v22 = vshll.u32 %v1091_v60, 16  ;;  %v677_v23 = vshll.u32 %v1092_v1, 16  ;;  %v1112_v63 = vld [vmem:[%s1432_s22 + $0x4c] sm:$0x1] }
  0x31   : > { %v660_v7 = vor.u32 %v659_v5, %v656_v4  ;;  %v665_v25 = vrot.slane %v663_v18, 5  ;;  %v670_v26 = vrot.slane %v668_v19, 4  ;;  %v682_v27 = vshrl.u32 %v1093_v9, 16  ;;  %1207 = vmatprep.subr.msk.bf16.mxu0 %vm226_vm0, %v1422_v10 }
  0x32   : > { %v647_v24 = vrot.slane %v646_v17, 4  ;;  %1174 = vmatmul.mubr.msk.bf16.vlgmr.msra.gmra.mxu1 %vm219_vm2, %v1084_v20  ;;  %v673_v29 = vrot.slane %v671_v22, 5  ;;  %v679_v30 = vrot.slane %v677_v23, 5  ;;  %v685_v12 = vshll.u32 %v1093_v9, 16 }
  0x33   : > { %v661_v28 = vrot.slane %v660_v7, 4  ;;  %1184 = vmatpush3.bf16.msra.mxu1 %v1439_v13  ;;  %v684_v33 = vrot.slane %v682_v27, 4  ;;  %v691_v34 = vshll.u32 %v1094_v21, 16  ;;  %v1096_v10 = vcombine.low %v1493_v37, %v1503_v48  ;;  %v1108_v13 = vld [vmem:[%s1432_s22 + $0x2c] sm:$0x1] }
  0x34   : > { %v652_v32 = vsel %vm1460_vm4, %v647_v24, %v651_v3  ;;  %v674_v39 = vor.u32 %v673_v29, %v670_v26  ;;  %v687_v40 = vrot.slane %v685_v12, 5  ;;  %v1097_v41 = vcombine.low %v1091_v60, %v1093_v9  ;;  %1208 = vmatprep.subr.msk.bf16.mxu1 %vm226_vm0, %v1427_v11 }
  0x35   : > { %v666_v38 = vsel %vm1460_vm4, %v661_v28, %v665_v25  ;;  %v693_v43 = vrot.slane %v691_v34, 5  ;;  %1179 = vmatprep.mubr.msk.bf16.mxu0 %vm219_vm2, %v1096_v10  ;;  %v849_v37 = vshrl.u32 %v1529_v31, 16  ;;  %v852_v44 = vshll.u32 %v1529_v31, 16 }
  0x36   : > { %v1101_v42 = vcombine.low %v652_v32, %v666_v38  ;;  %v675_v47 = vrot.slane %v674_v39, 4  ;;  %v688_v48 = vor.u32 %v687_v40, %v684_v33  ;;  %v858_v8 = vshll.u32 %v1106_v35, 16 }
  0x37   : > { %v863_v50 = vshrl.u32 %v1107_v36, 16  ;;  %1180 = vmatmul.mubr.msk.bf16.vlgmr.msra.gmra.mxu0 %vm219_vm2, %v1097_v41  ;;  %v851_v11 = vrot.slane %v849_v37, 4  ;;  %v854_v52 = vrot.slane %v852_v44, 5  ;;  %v866_v53 = vshll.u32 %v1107_v36, 16 }
  0x38   : > { %1185 = vmatprep.mubr.msk.bf16.mxu1 %vm219_vm2, %v1101_v42  ;;  %v872_v54 = vshll.u32 %v1108_v13, 16  ;;  %v680_v49 = vsel %vm1460_vm4, %v675_v47, %v679_v30  ;;  %v689_v56 = vrot.slane %v688_v48, 4  ;;  %1190 = vmatpush3.bf16.msra.mxu0 %v1443_v14  ;;  %v860_v6 = vrot.slane %v858_v8, 5 }
  0x39   : > { %v865_v57 = vrot.slane %v863_v50, 4  ;;  %v855_v58 = vor.u32 %v854_v52, %v851_v11  ;;  %v868_v59 = vrot.slane %v866_v53, 5  ;;  %v877_v61 = vshrl.u32 %v1109_v46, 16 }
  0x3a   : > { %v874_v60 = vrot.slane %v872_v54, 5  ;;  %v694_v62 = vsel %vm1460_vm4, %v689_v56, %v693_v43  ;;  %v880_v0 = vshll.u32 %v1109_v46, 16  ;;  %v886_v1 = vshll.u32 %v1110_v51, 16 }
  0x3b   : > { %v891_v2 = vshrl.u32 %v1111_v55, 16  ;;  %v1102_v3 = vcombine.low %v680_v49, %v694_v62  ;;  %v856_v4 = vrot.slane %v855_v58, 4  ;;  %v869_v5 = vor.u32 %v868_v59, %v865_v57 }
  0x3c   : > { %v879_v9 = vrot.slane %v877_v61, 4  ;;  %v882_v16 = vrot.slane %v880_v0, 5  ;;  %v894_v14 = vshll.u32 %v1111_v55, 16  ;;  %v900_v20 = vshll.u32 %v1112_v63, 16 }
  0x3d   : > { %v893_v17 = vrot.slane %v891_v2, 4  ;;  %1186 = vmatmul.mubr.msk.bf16.vlgmr.msra.gmra.mxu1 %vm219_vm2, %v1102_v3  ;;  %v861_v18 = vsel %vm1460_vm4, %v856_v4, %v860_v6  ;;  %v870_v19 = vrot.slane %v869_v5, 4  ;;  %v1114_v7 = vcombine.low %v1529_v31, %v1107_v36 }
  0x3e   : > { %1196 = vmatpush3.bf16.msra.mxu1 %v1447_v15  ;;  %v883_v21 = vor.u32 %v882_v16, %v879_v9  ;;  %v888_v22 = vrot.slane %v886_v1, 5  ;;  %v896_v23 = vrot.slane %v894_v14, 5  ;;  %v1115_v24 = vcombine.low %v1109_v46, %v1111_v55 }
  0x3f   : > { %v875_v25 = vsel %vm1460_vm4, %v870_v19, %v874_v60  ;;  %1191 = vmatprep.mubr.msk.bf16.mxu0 %vm219_vm2, %v1114_v7  ;;  %v902_v29 = vrot.slane %v900_v20, 5 }
  0x40   : > { %v1119_v26 = vcombine.low %v861_v18, %v875_v25  ;;  %v884_v27 = vrot.slane %v883_v21, 4  ;;  %v897_v28 = vor.u32 %v896_v23, %v893_v17  ;;  %1192 = vmatmul.mubr.msk.bf16.vlgmr.msra.gmra.mxu0 %vm219_vm2, %v1115_v24 }
  0x42   : > { %1197 = vmatprep.mubr.msk.bf16.mxu1 %vm219_vm2, %v1119_v26  ;;  %v889_v15 = vsel %vm1460_vm4, %v884_v27, %v888_v22  ;;  %v898_v30 = vrot.slane %v897_v28, 4 }
  0x44   : > { %v903_v12 = vsel %vm1460_vm4, %v898_v30, %v902_v29 }
  0x45   : > { %v1120_v31 = vcombine.low %v889_v15, %v903_v12 }
  0x47   : > { %1198 = vmatmul.mubr.msk.bf16.vlgmr.msra.gmra.mxu1 %vm219_vm2, %v1120_v31 }
  0xdf   : > { %v1163_v32 = vpop.f32.mrf.mxu1 }
  0xe1   : > { %v332_v33 = vpop.f32.mrf.mxu1 }
  0xe3   : > { %v1164_v35 = vpop.f32.mrf.mxu1 }
  0xe5   : > { %v335_v39 = vpop.f32.mrf.mxu1 }
  0xe7   : > { %v1157_v34 = vpop.f32.mrf.mxu0 }
  0xe8   : > { %v341_v44 = vadd.f32 %v1163_v32, %v1157_v34 }
  0xe9   : > { %v264_v10 = vpop.f32.mrf.mxu0 }
  0xea   : > { %v333_v47 = vadd.f32 %v332_v33, %v264_v10 }
  0xeb   : > { %v1158_v36 = vpop.f32.mrf.mxu0 }
  0xec   : > { %v344_v51 = vadd.f32 %v1164_v35, %v1158_v36 }
  0xed   : > { %v267_v38 = vpop.f32.mrf.mxu0 }
  0xee   : > { %v336_v53 = vadd.f32 %v335_v39, %v267_v38 }
  0xef   : > { %v1169_v40 = vpop.f32.mrf.mxu0 }
  0xf0   : > { %v428_v48 = vadd.f32 %v1169_v40, %v341_v44 }
  0xf1   : > { %v411_v41 = vpop.f32.mrf.mxu0 }
  0xf2   : > { %v1175_v13 = vpop.f32.mrf.mxu1  ;;  %v426_v11 = vadd.f32 %v411_v41, %v333_v47 }
  0xf3   : > { %v1170_v42 = vpop.f32.mrf.mxu0  ;;  %v554_v55 = vadd.f32 %v1175_v13, %v428_v48 }
  0xf4   : > { %v537_v43 = vpop.f32.mrf.mxu1  ;;  %v429_v54 = vadd.f32 %v1170_v42, %v344_v51 }
  0xf5   : > { %v414_v37 = vpop.f32.mrf.mxu0  ;;  %v552_v58 = vadd.f32 %v537_v43, %v426_v11 }
  0xf6   : > { %v1176_v45 = vpop.f32.mrf.mxu1  ;;  %v427_v6 = vadd.f32 %v414_v37, %v336_v53 }
  0xf7   : > { %v1181_v46 = vpop.f32.mrf.mxu0  ;;  %v555_v61 = vadd.f32 %v1176_v45, %v429_v54 }
  0xf8   : > { %v540_v8 = vpop.f32.mrf.mxu1  ;;  %v637_v57 = vadd.f32 %v1181_v46, %v554_v55 }
  0xf9   : > { %v620_v50 = vpop.f32.mrf.mxu0  ;;  %v553_v1 = vadd.f32 %v540_v8, %v427_v6 }
  0xfa   : > { %v635_v60 = vadd.f32 %v620_v50, %v552_v58 }
  0xfb   : > { %v1182_v52 = vpop.f32.mrf.mxu0 }
  0xfc   : > { %v638_v0 = vadd.f32 %v1182_v52, %v555_v61 }
  0xfd   : > { %v1187_v49 = vpop.f32.mrf.mxu1  ;;  %v623_v56 = vpop.f32.mrf.mxu0 }
  0xfe   : > { %v763_v2 = vadd.f32 %v1187_v49, %v637_v57  ;;  %v636_v5 = vadd.f32 %v623_v56, %v553_v1 }
  0xff   : > { %v746_v59 = vpop.f32.mrf.mxu1 }
 0x100   : > { %v1193_v62 = vpop.f32.mrf.mxu0  ;;  %v761_v16 = vadd.f32 %v746_v59, %v635_v60 }
 0x101   : > { %v1188_v63 = vpop.f32.mrf.mxu1  ;;  %v846_v9 = vadd.f32 %v1193_v62, %v763_v2 }
 0x102   : > { %v829_v3 = vpop.f32.mrf.mxu0  ;;  %v764_v18 = vadd.f32 %v1188_v63, %v638_v0 }
 0x103   : > { %v749_v4 = vpop.f32.mrf.mxu1  ;;  %v844_v14 = vadd.f32 %v829_v3, %v761_v16 }
 0x104   : > { %v1194_v17 = vpop.f32.mrf.mxu0  ;;  %v762_v22 = vadd.f32 %v749_v4, %v636_v5 }
 0x105   : > { %v847_v21 = vadd.f32 %v1194_v17, %v764_v18 }
 0x106   : > { %v832_v20 = vpop.f32.mrf.mxu0 }
 0x107   : > { %v1199_v19 = vpop.f32.mrf.mxu1  ;;  %v845_v25 = vadd.f32 %v832_v20, %v762_v22 }
 0x108   : > { %v972_v7 = vadd.f32 %v1199_v19, %v846_v9 }
 0x109   : > { %v955_v23 = vpop.f32.mrf.mxu1 }
 0x10a   : > { %976 = vst.msk [vmem:[%s136_s25 + $0x10] sm:$0xff] %vm219_vm2, %v972_v7  ;;  %v970_v24 = vadd.f32 %v955_v23, %v844_v14 }
 0x10b   : > { %v1200_v26 = vpop.f32.mrf.mxu1 }
 0x10c   : > { %974 = vst.msk [vmem:[%s136_s25] sm:$0xff] %vm219_vm2, %v970_v24  ;;  %v973_v27 = vadd.f32 %v1200_v26, %v847_v21 }
 0x10d   : > { %v958_v28 = vpop.f32.mrf.mxu1 }
 0x10e   : > { %977 = vst.msk [vmem:[%s136_s25 + $0x18] sm:$0xff] %vm219_vm2, %v973_v27  ;;  %v971_v29 = vadd.f32 %v958_v28, %v845_v25 }
 0x110   : > { %975 = vst.msk [vmem:[%s136_s25 + $0x8] sm:$0xff] %vm219_vm2, %v971_v29 }
 0x111   : > { %1272 = shalt.err (!%p1269_p3)
}
 0x112   : > { %s1273_s7 = scalar_lea.hbm %s1581_s30, 512  ;;  %s1277_s16 = scalar_lea.hbm %s1631_s2, 2048 }
 0x113   : > { %p1274_p4 = scmp.ne.s32.totalorder %s1581_s30, %s1273_s7  ;;  %p1278_p9 = scmp.lt.s32.totalorder %s1581_s30, %s1631_s2 }
 0x114   : > { %p1279_p10 = scmp.lt.s32.totalorder %s1277_s16, %s1273_s7 }
 0x115   : > { %p1275_p7 = pnand %p1274_p4, %p1377_p5 }
 0x116   : > { %p1280_p11 = por %p1279_p10, %p1278_p9 }
 0x117   : > { %p1276_p8 = pneg %p1275_p7 }
 0x119   : > { %p1281_p12 = pnand %p1280_p11, %p1276_p8 }
 0x11b   : > { %1284 = shalt.err (!%p1281_p12)
}
 0x11c   : > { %s1322_s22 = smov 128   ;;  %s1323_s23 = smov 8  }
 0x11d   : > { %1210 = dma.vmem_to_hbm [thread:$0]  (%p1377_p5), %s1583_s26, 512, %s1581_s30, %s1589_s13, %s1322_s22, %s1322_s22, %s1323_s23  }
 0x11e PF: > { %p1216_p13 = scmp.ge.s32.totalorder %s1319_s12, 2  ;;  %s1007_s24 = sand.u32 1, %s1307_s9  }
 0x11f   : > { %s1008_s25 = scalar_lea.sflag [#allocation3], %s1007_s24 }
 0x120   : > { %p1213_p0 = pnand %p1216_p13, %p1381_p6 }
 0x122   : > { %p1214_p1 = pneg %p1213_p0 }
 0x124   : > { %1302 = dma.done.wait (%p1214_p1), %s1008_s25, 512  }
 0x125   : > { %1304 = vsyncadd (%p1214_p1), %s1008_s25, 4294966784  ;;  %p12_p2 = scmp.ge.s32.totalorder %s1364_s15, 6   ;;  %s1636_s9 = smov %s1311_s10 }
 0x126   : > { %s1637_s10 = smov %s1315_s11  ;;  %s1638_s11 = smov %s1375_s18 }
 0x127   : > { %s1639_s12 = smov %s1364_s15  ;;  %14 = sbr.rel (!%p12_p2) target bundleno = 3 (0x3), region = 73 }
 0x12c   :  { %1013 = vsyncpa [#allocation3], 1 }
 0x12d   :  { %1015 = vsyncpa [#allocation3 + $0x1], 1 }

</bundles_post_ra>
